<compile_context>
chip_gen: v7x
topology: tpu7x:2x2x1
jax: 0.10.0
libtpu: 0.0.40
codegen_flags: <defaults>
</compile_context>

<pallas_src>
import jax
import jax.numpy as jnp
from jax.experimental import pallas as pl
from jax.experimental.pallas import tpu as pltpu

VALUE = 255.0
LANES = 128
MIN_GRID_STEPS = 4  # keep the read/write DMA streams double-buffered


def _device_kind() -> str:
    try:
        return jax.devices()[0].device_kind.lower()
    except Exception:
        return ""


def _generation_params(kind: str):
    """Returns (block_bytes_per_buffer, vmem_limit_bytes, use_core_parallel)."""
    if "v7" in kind:
        # 3.2 TB/s HBM: 8 MiB blocks keep the ~0.35 us per-step tax ~6%.
        # 4 buffers x 8 MiB = 32 MiB; 48 MiB limit < 64 MiB physical VMEM.
        return 8 * 1024 * 1024, 48 * 1024 * 1024, True
    if "v5 lite" in kind or "v5lite" in kind or "v5e" in kind:
        # 0.82 TB/s HBM: 4 MiB blocks already have <4% per-step overhead.
        return 4 * 1024 * 1024, 32 * 1024 * 1024, False
    # v6e (and default): 128 MiB physical VMEM, 1.4 TB/s HBM.
    return 8 * 1024 * 1024, 48 * 1024 * 1024, False


def _sublane_multiple(itemsize: int) -> int:
    # Rows per packed vreg sublane group: 8 for 4-byte, 16 for 2-byte, 32 for 1-byte.
    return max(8, 32 // max(1, min(itemsize, 4)))


def _round_up(x: int, m: int) -> int:
    return (x + m - 1) // m * m


def _make_divide_kernel(compute_dtype, value):
    inv = float(1.0 / value)  # multiply by reciprocal: 1 VALU op vs multi-op divide

    def kernel(x_ref, o_ref):
        x = x_ref[...].astype(compute_dtype)
        o_ref[...] = (x * jnp.asarray(inv, dtype=compute_dtype)).astype(o_ref.dtype)

    return kernel


def _divide_slab(slab: jnp.ndarray, out_dtype, *, alias_input: bool = False):
    """Run the Pallas kernel over a (rows, 128) lane-dense slab."""
    rows = slab.shape[0]
    kind = _device_kind()
    block_bytes, vmem_limit, use_core_parallel = _generation_params(kind)

    in_item = jnp.dtype(slab.dtype).itemsize
    out_item = jnp.dtype(out_dtype).itemsize
    sub = max(_sublane_multiple(in_item), _sublane_multiple(out_item))
    max_rows = max(sub, (block_bytes // (LANES * max(in_item, out_item))) // sub * sub)

    if rows <= MIN_GRID_STEPS * sub:
        # Tiny slab: one full-extent block (any row count is legal there).
        block_rows = rows
    else:
        # >= MIN_GRID_STEPS blocks so the read and write DMA streams overlap,
        # capped at the per-buffer VMEM budget; always a multiple of `sub`.
        block_rows = min(max_rows, _round_up(pl.cdiv(rows, MIN_GRID_STEPS), sub))

    grid_steps = pl.cdiv(rows, block_rows)

    if use_core_parallel and grid_steps >= 2:
        semantics = (pltpu.CORE_PARALLEL,)   # split streaming loop across both v7x TCs
    else:
        semantics = ("parallel",)

    compute_dtype = jnp.float32
    if (slab.dtype == jnp.dtype(out_dtype) == jnp.dtype(jnp.bfloat16)) and (
        "v6" in kind or "v7" in kind
    ):
        compute_dtype = jnp.bfloat16  # native bf16 VPU; halves vreg pressure

    aliases = (
        {0: 0} if (alias_input and slab.dtype == jnp.dtype(out_dtype)) else {}
    )

    return pl.pallas_call(
        _make_divide_kernel(compute_dtype, VALUE),
        out_shape=jax.ShapeDtypeStruct((rows, LANES), out_dtype),
        grid_spec=pltpu.PrefetchScalarGridSpec(
            num_scalar_prefetch=0,
            grid=(grid_steps,),
            in_specs=[pl.BlockSpec((block_rows, LANES), lambda i: (i, 0))],
            out_specs=pl.BlockSpec((block_rows, LANES), lambda i: (i, 0)),
        ),
        compiler_params=pltpu.CompilerParams(
            dimension_semantics=semantics,
            vmem_limit_bytes=vmem_limit,
        ),
        input_output_aliases=aliases,
    )(slab)


def tensor_divider(x, *, donate_input: bool = False) -> jnp.ndarray:
    """Equivalent of LanguageBindTensorDivider(value=255.0).forward(x)."""
    x = jnp.asarray(x)
    orig_shape = x.shape
    # Match torch promotion: floating dtypes stay, integers promote to float32.
    out_dtype = x.dtype if jnp.issubdtype(x.dtype, jnp.floating) else jnp.float32

    n = x.size
    if n == 0:
        return jnp.reshape(x.astype(out_dtype), orig_shape)

    if n % LANES != 0:
        # Misaligned element count: kernel-prefix + concatenate would add a
        # full extra HBM pass, so plain XLA (already at roofline) wins.
        return jnp.asarray(x / VALUE, dtype=out_dtype)

    # Aligned fast path: contiguous reshape only (free), zero extra HBM passes.
    slab = jnp.reshape(x, (n // LANES, LANES))
    out = _divide_slab(slab, out_dtype, alias_input=donate_input)
    return jnp.reshape(out, orig_shape)


if __name__ == "__main__":
    key = jax.random.PRNGKey(0)
    k1, k2, k3, k4 = jax.random.split(key, 4)

    fn = jax.jit(tensor_divider)

    # 1) float32 NCHW, 128-aligned (2*4*16*16 = 2048 elems -> 16 rows).
    x = jax.random.uniform(k1, (2, 4, 16, 16), dtype=jnp.float32) * 255.0
    y = jax.block_until_ready(fn(x))
    assert y.shape == x.shape and y.dtype == x.dtype
    assert jnp.allclose(y, x / VALUE, rtol=1e-6, atol=1e-6)

    # 2) uint8 -> float32 promotion path (image bytes).
    x_u8 = jax.random.randint(k2, (2, 3, 32, 32), 0, 256, dtype=jnp.int32).astype(jnp.uint8)
    y_u8 = jax.block_until_ready(fn(x_u8))
    assert y_u8.shape == x_u8.shape and y_u8.dtype == jnp.float32
    assert jnp.allclose(y_u8, x_u8.astype(jnp.float32) / VALUE, rtol=1e-6, atol=1e-6)

    # 3) multi-block grid with a partial last block (40 rows -> 3 blocks of 16).
    x_big = jax.random.uniform(k3, (4, 10, 128), dtype=jnp.float32) * 255.0
    y_big = jax.block_until_ready(fn(x_big))
    assert y_big.shape == x_big.shape and y_big.dtype == x_big.dtype
    assert jnp.allclose(y_big, x_big / VALUE, rtol=1e-6, atol=1e-6)

    # 4) misaligned element count -> plain-XLA fallback (no concat / extra HBM pass).
    x_odd = jax.random.uniform(k4, (3, 5, 29), dtype=jnp.float32) * 255.0
    y_odd = jax.block_until_ready(fn(x_odd))
    assert y_odd.shape == x_odd.shape and y_odd.dtype == x_odd.dtype
    assert jnp.allclose(y_odd, x_odd / VALUE, rtol=1e-6, atol=1e-6)

    print("KERNEL_OK")
</pallas_src>

<mosaic_0001>
module attributes {stable_mosaic.version = 11 : i64} {
  func.func @kernel(%arg0: i32, %arg1: memref<16x128xf32, #tpu.memory_space<vmem>>, %arg2: memref<16x128xf32, #tpu.memory_space<vmem>>) attributes {dimension_semantics = [#tpu.dimension_semantics<parallel>], iteration_bounds = array<i64: 1>, scalar_prefetch = 0 : i64, scratch_operands = 0 : i64, tpu.core_type = #tpu.core_type<tc>, window_params = [{transform_indices = @transform_0, window_bounds = array<i64: 16, 128>}, {transform_indices = @transform_1, window_bounds = array<i64: 16, 128>}]} {
    %c0 = arith.constant 0 : index
    %c0_0 = arith.constant 0 : index
    %0 = vector.load %arg1[%c0, %c0_0] : memref<16x128xf32, #tpu.memory_space<vmem>>, vector<16x128xf32>
    %cst = arith.constant 0.00392156886 : f32
    %1 = vector.broadcast %cst : f32 to vector<16x128xf32>
    %2 = arith.mulf %0, %1 : vector<16x128xf32>
    %c0_1 = arith.constant 0 : index
    %c0_2 = arith.constant 0 : index
    %3 = vector.load %arg2[%c0_1, %c0_2] : memref<16x128xf32, #tpu.memory_space<vmem>>, vector<16x128xf32>
    tpu.vector_store %arg2[%c0_1, %c0_2], %2 {strides = array<i32>} : memref<16x128xf32, #tpu.memory_space<vmem>>, vector<16x128xf32>,
    return
  }
  func.func @transform_0(%arg0: i32) -> (i32, i32) {
    %c0_i32 = arith.constant 0 : i32
    %c0_i32_0 = arith.constant 0 : i32
    return %arg0, %c0_i32 : i32, i32
  }
  func.func @transform_1(%arg0: i32) -> (i32, i32) {
    %c0_i32 = arith.constant 0 : i32
    %c0_i32_0 = arith.constant 0 : i32
    return %arg0, %c0_i32 : i32, i32
  }
}

</mosaic_0001>

<bundles_post_ra>
// kernel: tensor_divider.1
= control target key start
LH: loop header
LB: loop body
LE: loop exit
PB: predicated region body
PF: predicated region fallthrough
CT: control target
= control target key end

     0   :  { %s40_s0 = inlined_call_operand.vmem [shape: f32[16,128], index: 0, kind: input, shape index: {}]   ;;  %s41_s1 = inlined_call_operand.vmem [shape: f32[16,128], index: 1, kind: output, shape index: {}]  }
   0x1   :  { %v8_v0 = vld [vmem:[%s40_s0] sm:$0xff]  ;;  %v9_v1 = vld [vmem:[%s40_s0 + $0x8] sm:$0xff] }
   0x2   :  { %v10_v2 = vmul.f32 0.003921569, %v8_v0  ;;  %v11_v3 = vmul.f32 0.003921569, %v9_v1 }
   0x4   :  { %12 = vst [vmem:[%s41_s1] sm:$0xff] %v10_v2  ;;  %13 = vst [vmem:[%s41_s1 + $0x8] sm:$0xff] %v11_v3 }

</bundles_post_ra>
